<compile_context>
chip_gen: v5e
topology: v5e:2x2
jax: 0.10.0
libtpu: 0.0.40
codegen_flags: <defaults>
</compile_context>

<pallas_src>
import functools

import jax
import jax.numpy as jnp
from jax.experimental import pallas as pl
from jax.experimental.pallas import tpu as pltpu


def dcgru_kernel(a_ref, x_ref, h_ref,
                 wx_ru_ref, wh_ru_ref, wx_c_ref, wh_c_ref,
                 b_ru_ref, b_c_ref, out_ref, *, max_diffusion_step):
    """One batch element per grid invocation.

    a_ref:     (N, N)        precomputed (D^-1 (A+I))^T
    x_ref:     (N, Din)      inputs for this batch element
    h_ref:     (N, U)        previous hidden state
    wx_ru_ref: (M, Din, 2U)  x-part of the fused r/u weights (shared across batch)
    wh_ru_ref: (M, U, 2U)    h-part of the fused r/u weights
    wx_c_ref:  (M, Din, U)   x-part of the candidate weights
    wh_c_ref:  (M, U, U)     h-part of the candidate weights
    b_ru_ref:  (1, 2U)       r/u bias (bias_start = 1.0)
    b_c_ref:   (1, U)        candidate bias (bias_start = 0.0)
    out_ref:   (N, U)        new hidden state
    """
    K = max_diffusion_step
    M = K + 1

    a_t = a_ref[...]                       # (N, N)
    x = x_ref[...]                         # (N, Din)
    h = h_ref[...]                         # (N, U)
    N = x.shape[0]
    U = h.shape[1]

    def cheb(t0):
        """Chebyshev diffusion series [T_0 .. T_K] as a list (no lane concatenation)."""
        ts = [t0]
        if K >= 1:
            t1 = jnp.dot(a_t, t0, preferred_element_type=jnp.float32)
            ts.append(t1)
            tm2, tm1 = t0, t1
            for _ in range(2, K + 1):
                t2 = 2.0 * jnp.dot(a_t, tm1, preferred_element_type=jnp.float32) - tm2
                ts.append(t2)
                tm2, tm1 = tm1, t2
        return ts

    tx = cheb(x)                           # M terms of shape (N, Din), reused below
    th = cheb(h)                           # M terms of shape (N, U)

    # --- reset / update gates: one fused 2U-wide accumulation, split after sigmoid ---
    acc_ru = jnp.zeros((N, 2 * U), jnp.float32)
    for k in range(M):
        acc_ru += jnp.dot(tx[k], wx_ru_ref[k], preferred_element_type=jnp.float32)
        acc_ru += jnp.dot(th[k], wh_ru_ref[k], preferred_element_type=jnp.float32)
    ru = jax.nn.sigmoid(acc_ru + b_ru_ref[...])
    r = ru[:, :U]
    u = ru[:, U:]

    # --- candidate state on (x, r * h): reuse tx, diffuse only r*h ---
    trh = cheb(r * h)                      # M terms of shape (N, U)
    acc_c = jnp.zeros((N, U), jnp.float32)
    for k in range(M):
        acc_c += jnp.dot(tx[k], wx_c_ref[k], preferred_element_type=jnp.float32)
        acc_c += jnp.dot(trh[k], wh_c_ref[k], preferred_element_type=jnp.float32)
    c = jnp.tanh(acc_c + b_c_ref[...])

    out_ref[...] = u * h + (1.0 - u) * c


def dcgru_cell_forward(inputs, hx, adj, kparams, *, num_nodes, input_dim, num_units,
                       max_diffusion_step):
    """inputs: (B, N*Din), hx: (B, N*U), adj: (N, N)  ->  (B, N*U)"""
    B = inputs.shape[0]
    N, Din, U = num_nodes, input_dim, num_units
    K = max_diffusion_step
    M = K + 1
    F = Din + U

    # Constant graph prep, hoisted out of the kernel (adj is fixed across the RNN scan).
    a = adj + jnp.eye(N, dtype=adj.dtype)
    d_inv = 1.0 / jnp.sum(a, axis=1)
    d_inv = jnp.where(jnp.isinf(d_inv), jnp.zeros_like(d_inv), d_inv)
    a_norm_t = (d_inv[:, None] * a).T                       # (D^-1 (A+I))^T

    x3 = inputs.reshape(B, N, Din)
    h3 = hx.reshape(B, N, U)

    # Real (non-inflated) operation counts.
    diff_flops = 2 * N * N * K * (Din + 2 * U)              # x, h, r*h Chebyshev chains
    gate_flops = 2 * N * F * (3 * U) * M                    # r/u (2U) + candidate (U)
    ew_flops = 10 * N * U
    cost = pl.CostEstimate(
        flops=int(B * (diff_flops + gate_flops + ew_flops)),
        transcendentals=int(B * 3 * N * U),
        bytes_accessed=int(4 * (N * N + B * N * Din + 2 * B * N * U
                                + M * F * 3 * U + 3 * U)))

    kernel = functools.partial(dcgru_kernel, max_diffusion_step=K)

    out3 = pl.pallas_call(
        kernel,
        out_shape=jax.ShapeDtypeStruct((B, N, U), jnp.float32),
        grid=(B,),
        in_specs=[
            pl.BlockSpec((N, N), lambda b: (0, 0)),                 # a_norm_t (resident)
            pl.BlockSpec((None, N, Din), lambda b: (b, 0, 0)),      # x, per-batch block
            pl.BlockSpec((None, N, U), lambda b: (b, 0, 0)),        # h, per-batch block
            pl.BlockSpec((M, Din, 2 * U), lambda b: (0, 0, 0)),     # shared weights
            pl.BlockSpec((M, U, 2 * U), lambda b: (0, 0, 0)),
            pl.BlockSpec((M, Din, U), lambda b: (0, 0, 0)),
            pl.BlockSpec((M, U, U), lambda b: (0, 0, 0)),
            pl.BlockSpec((1, 2 * U), lambda b: (0, 0)),
            pl.BlockSpec((1, U), lambda b: (0, 0)),
        ],
        out_specs=pl.BlockSpec((None, N, U), lambda b: (b, 0, 0)),
        compiler_params=pltpu.CompilerParams(
            dimension_semantics=("parallel",)),
        cost_estimate=cost,
    )(a_norm_t, x3, h3,
      kparams["wx_ru"], kparams["wh_ru"], kparams["wx_c"], kparams["wh_c"],
      kparams["b_ru"], kparams["b_c"])

    return out3.reshape(B, N * U)


def make_params(key, *, input_dim, num_units, max_diffusion_step):
    """Deterministic synthetic parameters in the PyTorch module's layout."""
    F = input_dim + num_units
    M = max_diffusion_step + 1
    k_ru, k_c = jax.random.split(key)

    def xavier_normal(k, shape):
        fan_in, fan_out = shape
        std = (2.0 / (fan_in + fan_out)) ** 0.5
        return std * jax.random.normal(k, shape, dtype=jnp.float32)

    # PyTorch GCONV weight layout: rows indexed by f*M + k (feature-major, matrix fastest).
    w_ru = xavier_normal(k_ru, (F * M, 2 * num_units))       # _fn:    bias_start = 1.0
    b_ru = jnp.ones((2 * num_units,), jnp.float32)
    w_c = xavier_normal(k_c, (F * M, num_units))             # _gconv: bias_start = 0.0
    b_c = jnp.zeros((num_units,), jnp.float32)
    return {"w_ru": w_ru, "b_ru": b_ru, "w_c": w_c, "b_c": b_c}


def prepare_kernel_params(torch_params, *, input_dim, num_units, max_diffusion_step):
    """One-time weight prep: (F*M, O) torch layout -> per-k (M, F_part, O) weights,
    split into x- and h-parts, shared across batch (no block-diag expansion)."""
    Din, U = input_dim, num_units
    M = max_diffusion_step + 1
    F = Din + U

    def to_mfo(w, out_dim):   # torch row index f*M + k -> (M, F, out_dim)
        return jnp.transpose(w.reshape(F, M, out_dim), (1, 0, 2))

    w_ru = to_mfo(torch_params["w_ru"], 2 * U)               # (M, F, 2U)
    w_c = to_mfo(torch_params["w_c"], U)                     # (M, F, U)
    return {
        "wx_ru": w_ru[:, :Din, :],                           # (M, Din, 2U)
        "wh_ru": w_ru[:, Din:, :],                           # (M, U,   2U)
        "wx_c": w_c[:, :Din, :],                             # (M, Din, U)
        "wh_c": w_c[:, Din:, :],                             # (M, U,   U)
        "b_ru": torch_params["b_ru"].reshape(1, 2 * U),
        "b_c": torch_params["b_c"].reshape(1, U),
    }


def reference_forward(inputs, hx, adj, torch_params, *, num_nodes, input_dim,
                      num_units, max_diffusion_step):
    """Plain-JAX transcription of the PyTorch forward (for correctness check)."""
    B = inputs.shape[0]
    N, U, K = num_nodes, num_units, max_diffusion_step
    M = K + 1

    a = adj + jnp.eye(N, dtype=adj.dtype)
    d = a.sum(axis=1)
    d_inv = 1.0 / d
    d_inv = jnp.where(jnp.isinf(d_inv), jnp.zeros_like(d_inv), d_inv)
    adj_mx = (jnp.diag(d_inv) @ a).T

    def gconv(x_flat, state_flat, w, bias, out_dim):
        x = x_flat.reshape(B, N, -1)
        s = state_flat.reshape(B, N, -1)
        xs = jnp.concatenate([x, s], axis=2)
        F = xs.shape[2]
        x0 = jnp.transpose(xs, (1, 2, 0)).reshape(N, F * B)
        mats = [x0]
        if K > 0:
            x1 = adj_mx @ x0
            mats.append(x1)
            xm2, xm1 = x0, x1
            for _ in range(2, K + 1):
                x2 = 2.0 * (adj_mx @ xm1) - xm2
                mats.append(x2)
                xm2, xm1 = xm1, x2
        xc = jnp.stack(mats, 0).reshape(M, N, F, B)
        xc = jnp.transpose(xc, (3, 1, 2, 0)).reshape(B * N, F * M)
        out = xc @ w + bias
        return out.reshape(B, N * out_dim)

    value = jax.nn.sigmoid(
        gconv(inputs, hx, torch_params["w_ru"], torch_params["b_ru"], 2 * U))
    value = value.reshape(-1, N, 2 * U)
    r = value[..., :U].reshape(-1, N * U)
    u = value[..., U:].reshape(-1, N * U)
    c = gconv(inputs, r * hx, torch_params["w_c"], torch_params["b_c"], U)
    c = jnp.tanh(c)
    return u * hx + (1.0 - u) * c


if __name__ == "__main__":
    # Small, module-consistent shapes.
    B = 2
    num_nodes = 16
    input_dim = 4
    num_units = 32
    max_diffusion_step = 2

    key = jax.random.PRNGKey(0)
    k_adj, k_x, k_h, k_w = jax.random.split(key, 4)

    adj = jax.random.uniform(k_adj, (num_nodes, num_nodes), dtype=jnp.float32)
    inputs = jax.random.normal(k_x, (B, num_nodes * input_dim), dtype=jnp.float32)
    hx = jax.random.normal(k_h, (B, num_nodes * num_units), dtype=jnp.float32)

    torch_params = make_params(k_w, input_dim=input_dim, num_units=num_units,
                               max_diffusion_step=max_diffusion_step)
    kparams = prepare_kernel_params(torch_params, input_dim=input_dim,
                                    num_units=num_units,
                                    max_diffusion_step=max_diffusion_step)

    out = dcgru_cell_forward(inputs, hx, adj, kparams, num_nodes=num_nodes,
                             input_dim=input_dim, num_units=num_units,
                             max_diffusion_step=max_diffusion_step)
    out = jax.block_until_ready(out)

    ref = reference_forward(inputs, hx, adj, torch_params, num_nodes=num_nodes,
                            input_dim=input_dim, num_units=num_units,
                            max_diffusion_step=max_diffusion_step)
    ref = jax.block_until_ready(ref)

    assert out.shape == (B, num_nodes * num_units)
    assert jnp.allclose(out, ref, atol=1e-4, rtol=1e-4)
    print("KERNEL_OK")
</pallas_src>

<mosaic_0001>
module attributes {stable_mosaic.version = 11 : i64} {
  func.func @dcgru_kernel(%arg0: i32, %arg1: memref<16x16xf32, #tpu.memory_space<vmem>>, %arg2: memref<1x16x4xf32, #tpu.memory_space<vmem>>, %arg3: memref<1x16x32xf32, #tpu.memory_space<vmem>>, %arg4: memref<3x4x64xf32, #tpu.memory_space<vmem>>, %arg5: memref<3x32x64xf32, #tpu.memory_space<vmem>>, %arg6: memref<3x4x32xf32, #tpu.memory_space<vmem>>, %arg7: memref<3x32x32xf32, #tpu.memory_space<vmem>>, %arg8: memref<1x64xf32, #tpu.memory_space<vmem>>, %arg9: memref<1x32xf32, #tpu.memory_space<vmem>>, %arg10: memref<1x16x32xf32, #tpu.memory_space<vmem>>) attributes {dimension_semantics = [#tpu.dimension_semantics<parallel>], iteration_bounds = array<i64: 2>, scalar_prefetch = 0 : i64, scratch_operands = 0 : i64, tpu.core_type = #tpu.core_type<tc>, window_params = [{pipeline_mode = #tpu.pipeline_mode<synchronous>, transform_indices = @transform_0, window_bounds = array<i64: 16, 16>}, {transform_indices = @transform_1, window_bounds = array<i64: 1, 16, 4>}, {transform_indices = @transform_2, window_bounds = array<i64: 1, 16, 32>}, {pipeline_mode = #tpu.pipeline_mode<synchronous>, transform_indices = @transform_3, window_bounds = array<i64: 3, 4, 64>}, {pipeline_mode = #tpu.pipeline_mode<synchronous>, transform_indices = @transform_4, window_bounds = array<i64: 3, 32, 64>}, {pipeline_mode = #tpu.pipeline_mode<synchronous>, transform_indices = @transform_5, window_bounds = array<i64: 3, 4, 32>}, {pipeline_mode = #tpu.pipeline_mode<synchronous>, transform_indices = @transform_6, window_bounds = array<i64: 3, 32, 32>}, {pipeline_mode = #tpu.pipeline_mode<synchronous>, transform_indices = @transform_7, window_bounds = array<i64: 1, 64>}, {pipeline_mode = #tpu.pipeline_mode<synchronous>, transform_indices = @transform_8, window_bounds = array<i64: 1, 32>}, {transform_indices = @transform_9, window_bounds = array<i64: 1, 16, 32>}]} {
    %c0 = arith.constant 0 : index
    %c0_0 = arith.constant 0 : index
    %0 = vector.load %arg1[%c0, %c0_0] : memref<16x16xf32, #tpu.memory_space<vmem>>, vector<16x16xf32>
    %c0_1 = arith.constant 0 : index
    %c0_2 = arith.constant 0 : index
    %c0_3 = arith.constant 0 : index
    %1 = vector.load %arg2[%c0_1, %c0_2, %c0_3] : memref<1x16x4xf32, #tpu.memory_space<vmem>>, vector<1x16x4xf32>
    %2 = vector.shape_cast %1 : vector<1x16x4xf32> to vector<16x4xf32>
    %c0_4 = arith.constant 0 : index
    %c0_5 = arith.constant 0 : index
    %c0_6 = arith.constant 0 : index
    %3 = vector.load %arg3[%c0_4, %c0_5, %c0_6] : memref<1x16x32xf32, #tpu.memory_space<vmem>>, vector<1x16x32xf32>
    %4 = vector.shape_cast %3 : vector<1x16x32xf32> to vector<16x32xf32>
    %cst = arith.constant dense<0.000000e+00> : vector<16x4xf32>
    %5 = tpu.matmul %0, %2, %cst {dimension_numbers = #tpu.dot_dimension_numbers<[1], [0], [0], [1], [0, 0, 1, 1], [], []>} : vector<16x16xf32>, vector<16x4xf32>, vector<16x4xf32> -> vector<16x4xf32>
    %cst_7 = arith.constant dense<0.000000e+00> : vector<16x4xf32>
    %6 = tpu.matmul %0, %5, %cst_7 {dimension_numbers = #tpu.dot_dimension_numbers<[1], [0], [0], [1], [0, 0, 1, 1], [], []>} : vector<16x16xf32>, vector<16x4xf32>, vector<16x4xf32> -> vector<16x4xf32>
    %cst_8 = arith.constant 2.000000e+00 : f32
    %7 = vector.broadcast %cst_8 : f32 to vector<16x4xf32>
    %8 = arith.mulf %7, %6 : vector<16x4xf32>
    %9 = arith.subf %8, %2 : vector<16x4xf32>
    %cst_9 = arith.constant dense<0.000000e+00> : vector<16x32xf32>
    %10 = tpu.matmul %0, %4, %cst_9 {dimension_numbers = #tpu.dot_dimension_numbers<[1], [0], [0], [1], [0, 0, 1, 1], [], []>} : vector<16x16xf32>, vector<16x32xf32>, vector<16x32xf32> -> vector<16x32xf32>
    %cst_10 = arith.constant dense<0.000000e+00> : vector<16x32xf32>
    %11 = tpu.matmul %0, %10, %cst_10 {dimension_numbers = #tpu.dot_dimension_numbers<[1], [0], [0], [1], [0, 0, 1, 1], [], []>} : vector<16x16xf32>, vector<16x32xf32>, vector<16x32xf32> -> vector<16x32xf32>
    %cst_11 = arith.constant 2.000000e+00 : f32
    %12 = vector.broadcast %cst_11 : f32 to vector<16x32xf32>
    %13 = arith.mulf %12, %11 : vector<16x32xf32>
    %14 = arith.subf %13, %4 : vector<16x32xf32>
    %cst_12 = arith.constant 0.000000e+00 : f32
    %15 = vector.broadcast %cst_12 : f32 to vector<16x64xf32>
    %c0_13 = arith.constant 0 : index
    %c0_14 = arith.constant 0 : index
    %c0_15 = arith.constant 0 : index
    %16 = vector.load %arg4[%c0_13, %c0_14, %c0_15] : memref<3x4x64xf32, #tpu.memory_space<vmem>>, vector<1x4x64xf32>
    %17 = vector.shape_cast %16 : vector<1x4x64xf32> to vector<4x64xf32>
    %cst_16 = arith.constant dense<0.000000e+00> : vector<16x64xf32>
    %18 = tpu.matmul %2, %17, %cst_16 {dimension_numbers = #tpu.dot_dimension_numbers<[1], [0], [0], [1], [0, 0, 1, 1], [], []>} : vector<16x4xf32>, vector<4x64xf32>, vector<16x64xf32> -> vector<16x64xf32>
    %19 = arith.addf %15, %18 : vector<16x64xf32>
    %c0_17 = arith.constant 0 : index
    %c0_18 = arith.constant 0 : index
    %c0_19 = arith.constant 0 : index
    %20 = vector.load %arg5[%c0_17, %c0_18, %c0_19] : memref<3x32x64xf32, #tpu.memory_space<vmem>>, vector<1x32x64xf32>
    %21 = vector.shape_cast %20 : vector<1x32x64xf32> to vector<32x64xf32>
    %cst_20 = arith.constant dense<0.000000e+00> : vector<16x64xf32>
    %22 = tpu.matmul %4, %21, %cst_20 {dimension_numbers = #tpu.dot_dimension_numbers<[1], [0], [0], [1], [0, 0, 1, 1], [], []>} : vector<16x32xf32>, vector<32x64xf32>, vector<16x64xf32> -> vector<16x64xf32>
    %23 = arith.addf %19, %22 : vector<16x64xf32>
    %c1 = arith.constant 1 : index
    %c0_21 = arith.constant 0 : index
    %c0_22 = arith.constant 0 : index
    %24 = vector.load %arg4[%c1, %c0_21, %c0_22] : memref<3x4x64xf32, #tpu.memory_space<vmem>>, vector<1x4x64xf32>
    %25 = vector.shape_cast %24 : vector<1x4x64xf32> to vector<4x64xf32>
    %cst_23 = arith.constant dense<0.000000e+00> : vector<16x64xf32>
    %26 = tpu.matmul %5, %25, %cst_23 {dimension_numbers = #tpu.dot_dimension_numbers<[1], [0], [0], [1], [0, 0, 1, 1], [], []>} : vector<16x4xf32>, vector<4x64xf32>, vector<16x64xf32> -> vector<16x64xf32>
    %27 = arith.addf %23, %26 : vector<16x64xf32>
    %c1_24 = arith.constant 1 : index
    %c0_25 = arith.constant 0 : index
    %c0_26 = arith.constant 0 : index
    %28 = vector.load %arg5[%c1_24, %c0_25, %c0_26] : memref<3x32x64xf32, #tpu.memory_space<vmem>>, vector<1x32x64xf32>
    %29 = vector.shape_cast %28 : vector<1x32x64xf32> to vector<32x64xf32>
    %cst_27 = arith.constant dense<0.000000e+00> : vector<16x64xf32>
    %30 = tpu.matmul %10, %29, %cst_27 {dimension_numbers = #tpu.dot_dimension_numbers<[1], [0], [0], [1], [0, 0, 1, 1], [], []>} : vector<16x32xf32>, vector<32x64xf32>, vector<16x64xf32> -> vector<16x64xf32>
    %31 = arith.addf %27, %30 : vector<16x64xf32>
    %c2 = arith.constant 2 : index
    %c0_28 = arith.constant 0 : index
    %c0_29 = arith.constant 0 : index
    %32 = vector.load %arg4[%c2, %c0_28, %c0_29] : memref<3x4x64xf32, #tpu.memory_space<vmem>>, vector<1x4x64xf32>
    %33 = vector.shape_cast %32 : vector<1x4x64xf32> to vector<4x64xf32>
    %cst_30 = arith.constant dense<0.000000e+00> : vector<16x64xf32>
    %34 = tpu.matmul %9, %33, %cst_30 {dimension_numbers = #tpu.dot_dimension_numbers<[1], [0], [0], [1], [0, 0, 1, 1], [], []>} : vector<16x4xf32>, vector<4x64xf32>, vector<16x64xf32> -> vector<16x64xf32>
    %35 = arith.addf %31, %34 : vector<16x64xf32>
    %c2_31 = arith.constant 2 : index
    %c0_32 = arith.constant 0 : index
    %c0_33 = arith.constant 0 : index
    %36 = vector.load %arg5[%c2_31, %c0_32, %c0_33] : memref<3x32x64xf32, #tpu.memory_space<vmem>>, vector<1x32x64xf32>
    %37 = vector.shape_cast %36 : vector<1x32x64xf32> to vector<32x64xf32>
    %cst_34 = arith.constant dense<0.000000e+00> : vector<16x64xf32>
    %38 = tpu.matmul %14, %37, %cst_34 {dimension_numbers = #tpu.dot_dimension_numbers<[1], [0], [0], [1], [0, 0, 1, 1], [], []>} : vector<16x32xf32>, vector<32x64xf32>, vector<16x64xf32> -> vector<16x64xf32>
    %39 = arith.addf %35, %38 : vector<16x64xf32>
    %c0_35 = arith.constant 0 : index
    %c0_36 = arith.constant 0 : index
    %40 = vector.load %arg8[%c0_35, %c0_36] : memref<1x64xf32, #tpu.memory_space<vmem>>, vector<1x64xf32>
    %41 = vector.broadcast %40 : vector<1x64xf32> to vector<16x64xf32>
    %42 = arith.addf %39, %41 : vector<16x64xf32>
    %43 = arith.negf %42 : vector<16x64xf32>
    %44 = math.exp %43 : vector<16x64xf32>
    %cst_37 = arith.constant 1.000000e+00 : f32
    %45 = vector.broadcast %cst_37 : f32 to vector<16x64xf32>
    %46 = arith.addf %45, %44 : vector<16x64xf32>
    %47 = arith.divf %45, %46 : vector<16x64xf32>
    %48 = vector.extract_strided_slice %47 {offsets = [0, 0], sizes = [16, 32], strides = [1, 1]} : vector<16x64xf32> to vector<16x32xf32>
    %49 = vector.extract_strided_slice %47 {offsets = [0, 32], sizes = [16, 32], strides = [1, 1]} : vector<16x64xf32> to vector<16x32xf32>
    %50 = arith.mulf %48, %4 : vector<16x32xf32>
    %cst_38 = arith.constant dense<0.000000e+00> : vector<16x32xf32>
    %51 = tpu.matmul %0, %50, %cst_38 {dimension_numbers = #tpu.dot_dimension_numbers<[1], [0], [0], [1], [0, 0, 1, 1], [], []>} : vector<16x16xf32>, vector<16x32xf32>, vector<16x32xf32> -> vector<16x32xf32>
    %cst_39 = arith.constant dense<0.000000e+00> : vector<16x32xf32>
    %52 = tpu.matmul %0, %51, %cst_39 {dimension_numbers = #tpu.dot_dimension_numbers<[1], [0], [0], [1], [0, 0, 1, 1], [], []>} : vector<16x16xf32>, vector<16x32xf32>, vector<16x32xf32> -> vector<16x32xf32>
    %cst_40 = arith.constant 2.000000e+00 : f32
    %53 = vector.broadcast %cst_40 : f32 to vector<16x32xf32>
    %54 = arith.mulf %53, %52 : vector<16x32xf32>
    %55 = arith.subf %54, %50 : vector<16x32xf32>
    %cst_41 = arith.constant 0.000000e+00 : f32
    %56 = vector.broadcast %cst_41 : f32 to vector<16x32xf32>
    %c0_42 = arith.constant 0 : index
    %c0_43 = arith.constant 0 : index
    %c0_44 = arith.constant 0 : index
    %57 = vector.load %arg6[%c0_42, %c0_43, %c0_44] : memref<3x4x32xf32, #tpu.memory_space<vmem>>, vector<1x4x32xf32>
    %58 = vector.shape_cast %57 : vector<1x4x32xf32> to vector<4x32xf32>
    %cst_45 = arith.constant dense<0.000000e+00> : vector<16x32xf32>
    %59 = tpu.matmul %2, %58, %cst_45 {dimension_numbers = #tpu.dot_dimension_numbers<[1], [0], [0], [1], [0, 0, 1, 1], [], []>} : vector<16x4xf32>, vector<4x32xf32>, vector<16x32xf32> -> vector<16x32xf32>
    %60 = arith.addf %56, %59 : vector<16x32xf32>
    %c0_46 = arith.constant 0 : index
    %c0_47 = arith.constant 0 : index
    %c0_48 = arith.constant 0 : index
    %61 = vector.load %arg7[%c0_46, %c0_47, %c0_48] : memref<3x32x32xf32, #tpu.memory_space<vmem>>, vector<1x32x32xf32>
    %62 = vector.shape_cast %61 : vector<1x32x32xf32> to vector<32x32xf32>
    %cst_49 = arith.constant dense<0.000000e+00> : vector<16x32xf32>
    %63 = tpu.matmul %50, %62, %cst_49 {dimension_numbers = #tpu.dot_dimension_numbers<[1], [0], [0], [1], [0, 0, 1, 1], [], []>} : vector<16x32xf32>, vector<32x32xf32>, vector<16x32xf32> -> vector<16x32xf32>
    %64 = arith.addf %60, %63 : vector<16x32xf32>
    %c1_50 = arith.constant 1 : index
    %c0_51 = arith.constant 0 : index
    %c0_52 = arith.constant 0 : index
    %65 = vector.load %arg6[%c1_50, %c0_51, %c0_52] : memref<3x4x32xf32, #tpu.memory_space<vmem>>, vector<1x4x32xf32>
    %66 = vector.shape_cast %65 : vector<1x4x32xf32> to vector<4x32xf32>
    %cst_53 = arith.constant dense<0.000000e+00> : vector<16x32xf32>
    %67 = tpu.matmul %5, %66, %cst_53 {dimension_numbers = #tpu.dot_dimension_numbers<[1], [0], [0], [1], [0, 0, 1, 1], [], []>} : vector<16x4xf32>, vector<4x32xf32>, vector<16x32xf32> -> vector<16x32xf32>
    %68 = arith.addf %64, %67 : vector<16x32xf32>
    %c1_54 = arith.constant 1 : index
    %c0_55 = arith.constant 0 : index
    %c0_56 = arith.constant 0 : index
    %69 = vector.load %arg7[%c1_54, %c0_55, %c0_56] : memref<3x32x32xf32, #tpu.memory_space<vmem>>, vector<1x32x32xf32>
    %70 = vector.shape_cast %69 : vector<1x32x32xf32> to vector<32x32xf32>
    %cst_57 = arith.constant dense<0.000000e+00> : vector<16x32xf32>
    %71 = tpu.matmul %51, %70, %cst_57 {dimension_numbers = #tpu.dot_dimension_numbers<[1], [0], [0], [1], [0, 0, 1, 1], [], []>} : vector<16x32xf32>, vector<32x32xf32>, vector<16x32xf32> -> vector<16x32xf32>
    %72 = arith.addf %68, %71 : vector<16x32xf32>
    %c2_58 = arith.constant 2 : index
    %c0_59 = arith.constant 0 : index
    %c0_60 = arith.constant 0 : index
    %73 = vector.load %arg6[%c2_58, %c0_59, %c0_60] : memref<3x4x32xf32, #tpu.memory_space<vmem>>, vector<1x4x32xf32>
    %74 = vector.shape_cast %73 : vector<1x4x32xf32> to vector<4x32xf32>
    %cst_61 = arith.constant dense<0.000000e+00> : vector<16x32xf32>
    %75 = tpu.matmul %9, %74, %cst_61 {dimension_numbers = #tpu.dot_dimension_numbers<[1], [0], [0], [1], [0, 0, 1, 1], [], []>} : vector<16x4xf32>, vector<4x32xf32>, vector<16x32xf32> -> vector<16x32xf32>
    %76 = arith.addf %72, %75 : vector<16x32xf32>
    %c2_62 = arith.constant 2 : index
    %c0_63 = arith.constant 0 : index
    %c0_64 = arith.constant 0 : index
    %77 = vector.load %arg7[%c2_62, %c0_63, %c0_64] : memref<3x32x32xf32, #tpu.memory_space<vmem>>, vector<1x32x32xf32>
    %78 = vector.shape_cast %77 : vector<1x32x32xf32> to vector<32x32xf32>
    %cst_65 = arith.constant dense<0.000000e+00> : vector<16x32xf32>
    %79 = tpu.matmul %55, %78, %cst_65 {dimension_numbers = #tpu.dot_dimension_numbers<[1], [0], [0], [1], [0, 0, 1, 1], [], []>} : vector<16x32xf32>, vector<32x32xf32>, vector<16x32xf32> -> vector<16x32xf32>
    %80 = arith.addf %76, %79 : vector<16x32xf32>
    %c0_66 = arith.constant 0 : index
    %c0_67 = arith.constant 0 : index
    %81 = vector.load %arg9[%c0_66, %c0_67] : memref<1x32xf32, #tpu.memory_space<vmem>>, vector<1x32xf32>
    %82 = vector.broadcast %81 : vector<1x32xf32> to vector<16x32xf32>
    %83 = arith.addf %80, %82 : vector<16x32xf32>
    %84 = math.tanh %83 : vector<16x32xf32>
    %85 = arith.mulf %49, %4 : vector<16x32xf32>
    %cst_68 = arith.constant 1.000000e+00 : f32
    %86 = vector.broadcast %cst_68 : f32 to vector<16x32xf32>
    %87 = arith.subf %86, %49 : vector<16x32xf32>
    %88 = arith.mulf %87, %84 : vector<16x32xf32>
    %89 = arith.addf %85, %88 : vector<16x32xf32>
    %c0_69 = arith.constant 0 : index
    %c0_70 = arith.constant 0 : index
    %c0_71 = arith.constant 0 : index
    %90 = vector.load %arg10[%c0_69, %c0_70, %c0_71] : memref<1x16x32xf32, #tpu.memory_space<vmem>>, vector<1x16x32xf32>
    %91 = vector.shape_cast %90 : vector<1x16x32xf32> to vector<16x32xf32>
    %92 = vector.shape_cast %89 : vector<16x32xf32> to vector<1x16x32xf32>
    tpu.vector_store %arg10[%c0_69, %c0_70, %c0_71], %92 {strides = array<i32>} : memref<1x16x32xf32, #tpu.memory_space<vmem>>, vector<1x16x32xf32>,
    return
  }
  func.func @transform_0(%arg0: i32) -> (i32, i32) {
    %c0_i32 = arith.constant 0 : i32
    %c0_i32_0 = arith.constant 0 : i32
    %c0_i32_1 = arith.constant 0 : i32
    return %c0_i32, %c0_i32_0 : i32, i32
  }
  func.func @transform_1(%arg0: i32) -> (i32, i32, i32) {
    %c0_i32 = arith.constant 0 : i32
    %c0_i32_0 = arith.constant 0 : i32
    %c0_i32_1 = arith.constant 0 : i32
    return %arg0, %c0_i32, %c0_i32_0 : i32, i32, i32
  }
  func.func @transform_2(%arg0: i32) -> (i32, i32, i32) {
    %c0_i32 = arith.constant 0 : i32
    %c0_i32_0 = arith.constant 0 : i32
    %c0_i32_1 = arith.constant 0 : i32
    return %arg0, %c0_i32, %c0_i32_0 : i32, i32, i32
  }
  func.func @transform_3(%arg0: i32) -> (i32, i32, i32) {
    %c0_i32 = arith.constant 0 : i32
    %c0_i32_0 = arith.constant 0 : i32
    %c0_i32_1 = arith.constant 0 : i32
    %c0_i32_2 = arith.constant 0 : i32
    return %c0_i32, %c0_i32_0, %c0_i32_1 : i32, i32, i32
  }
  func.func @transform_4(%arg0: i32) -> (i32, i32, i32) {
    %c0_i32 = arith.constant 0 : i32
    %c0_i32_0 = arith.constant 0 : i32
    %c0_i32_1 = arith.constant 0 : i32
    %c0_i32_2 = arith.constant 0 : i32
    return %c0_i32, %c0_i32_0, %c0_i32_1 : i32, i32, i32
  }
  func.func @transform_5(%arg0: i32) -> (i32, i32, i32) {
    %c0_i32 = arith.constant 0 : i32
    %c0_i32_0 = arith.constant 0 : i32
    %c0_i32_1 = arith.constant 0 : i32
    %c0_i32_2 = arith.constant 0 : i32
    return %c0_i32, %c0_i32_0, %c0_i32_1 : i32, i32, i32
  }
  func.func @transform_6(%arg0: i32) -> (i32, i32, i32) {
    %c0_i32 = arith.constant 0 : i32
    %c0_i32_0 = arith.constant 0 : i32
    %c0_i32_1 = arith.constant 0 : i32
    %c0_i32_2 = arith.constant 0 : i32
    return %c0_i32, %c0_i32_0, %c0_i32_1 : i32, i32, i32
  }
  func.func @transform_7(%arg0: i32) -> (i32, i32) {
    %c0_i32 = arith.constant 0 : i32
    %c0_i32_0 = arith.constant 0 : i32
    %c0_i32_1 = arith.constant 0 : i32
    return %c0_i32, %c0_i32_0 : i32, i32
  }
  func.func @transform_8(%arg0: i32) -> (i32, i32) {
    %c0_i32 = arith.constant 0 : i32
    %c0_i32_0 = arith.constant 0 : i32
    %c0_i32_1 = arith.constant 0 : i32
    return %c0_i32, %c0_i32_0 : i32, i32
  }
  func.func @transform_9(%arg0: i32) -> (i32, i32, i32) {
    %c0_i32 = arith.constant 0 : i32
    %c0_i32_0 = arith.constant 0 : i32
    %c0_i32_1 = arith.constant 0 : i32
    return %arg0, %c0_i32, %c0_i32_0 : i32, i32, i32
  }
}

</mosaic_0001>

<bundles_post_ra>
// kernel: tpu_custom_call.1
= control target key start
LH: loop header
LB: loop body
LE: loop exit
PB: predicated region body
PF: predicated region fallthrough
CT: control target
= control target key end

     0   :  { %s1910_s0 = inlined_call_operand.hbm [shape: f32[16,16], index: 0, kind: input, shape index: {}]   ;;  %s1911_s1 = inlined_call_operand.vmem [shape: f32[2,16,4], index: 1, kind: input, shape index: {}]   ;;  %s1912_s2 = inlined_call_operand.vmem [shape: f32[2,16,32], index: 2, kind: input, shape index: {}]   ;;  %s1913_s3 = inlined_call_operand.hbm [shape: f32[3,4,64], index: 3, kind: input, shape index: {}]   ;;  %s1914_s4 = inlined_call_operand.hbm [shape: f32[3,32,64], index: 4, kind: input, shape index: {}]   ;;  %s1915_s5 = inlined_call_operand.vmem [shape: f32[3,4,32], index: 5, kind: input, shape index: {}]   ;;  %s1916_s6 = inlined_call_operand.hbm [shape: f32[3,32,32], index: 6, kind: input, shape index: {}]   ;;  %s1917_s7 = inlined_call_operand.vmem [shape: f32[1,64], index: 7, kind: input, shape index: {}]   ;;  %s1918_s8 = inlined_call_operand.vmem [shape: f32[1,32], index: 8, kind: input, shape index: {}]   ;;  %s1919_s9 = inlined_call_operand.hbm [shape: f32[2,16,32], index: 9, kind: output, shape index: {}]  }
   0x1   :  { %1924 = sst [smem:[#allocation19_spill]] %s1910_s0 }
   0x2   :  { %1925 = sst [smem:[#allocation20_spill]] %s1913_s3 }
   0x3   :  { %14 = vsyncpa [#allocation3], 0 }
   0x4   :  { %15 = vsyncpa [#allocation6], 0 }
   0x5   :  { %16 = vsyncpa [#allocation9], 0 }
   0x6   :  { %17 = vsyncpa [#allocation4], 0 }
   0x7   :  { %19 = vsyncpa [#allocation4 + $0x1], 0  ;;  %s1638_s30 = smov 0   ;;  %s1640_s10 = smov 0  }
   0x8   :  { %s1642_s11 = smov 0   ;;  %s1644_s12 = smov 0  }
   0x9 LB: > { %1926 = sst [smem:[#allocation15_spill]] %s1570_s11  ;;  %s1659_s13 = sadd.s32 4294967295, %s1574_s12   ;;  %s1574_s12 = sphi %s1644_s12, %s1937_s12   ;;  %s1570_s11 = sphi %s1642_s11, %s1939_s11   ;;  %s1566_s10 = sphi %s1640_s10, %s1941_s10   ;;  %s1562_s30 = sphi %s1638_s30, %s1940_s30  }
   0xa   : > { %s1203_s14 = sadd.s32 4294967294, %s1574_s12   ;;  %s1663_s15 = sadd.s32 1, %s1574_s12  }
   0xb   : > { %1927 = sst [smem:[#allocation16_spill]] %s1663_s15  ;;  %s231_s16 = sadd.s32 1, %s1570_s11 }
   0xc   : > { %s228_s17 = ssub.s32 %s1574_s12, %s1663_s15  ;;  %p241_p0 = scmp.ne.s32.totalorder %s1570_s11, %s1566_s10 }
   0xd   : > { %p229_p1 = scmp.eq.s32.totalorder %s228_s17, 0  ;;  %p242_p2 = scmp.eq.s32.totalorder %s1659_s13, 1 }
   0xe   : > { %p247_p3 = scmp.ne.s32.totalorder %s1566_s10, %s1562_s30  ;;  %p248_p4 = scmp.eq.s32.totalorder %s1203_s14, 1 }
   0xf   : > { %s1674_s18 = scalar_select %p229_p1, %s1570_s11, %s231_s16  }
  0x10   : > { %p1676_p5 = por %p242_p2, %p241_p0  ;;  %p1680_p6 = por %p248_p4, %p247_p3 }
  0x11   : > { %1928 = sst [smem:[#allocation17_spill]] %s1674_s18  ;;  %p1204_p7 = scmp.ge.s32.totalorder %s1574_s12, 1 }
  0x12   : > { %s1930_s20 = scalar_select %p1680_p6, 1, 0 }
  0x13   : > { %p255_p8 = scmp.lt.s32.totalorder %s1574_s12, 3  ;;  %p1313_p9 = scmp.eq.s32.totalorder %s1659_s13, 0 }
  0x14   : > { %1931 = sst [smem:[#allocation18_spill]] %s1930_s20  ;;  %s1576_s25 = smov [#allocation5]  }
  0x15   : > { %p1687_p10 = pnand %p1204_p7, %p255_p8  ;;  %s1933_s3 = sld [smem:[#allocation20_spill]] }
  0x16   : > { %s282_s26 = sshll.u32 %s1576_s25, 4  ;;  %s1935_s0 = sld [smem:[#allocation19_spill]]  ;;  %s283_s26 = int_to_ptr.vmem [resolvable:$true] %s282_s26 }
  0x17   : > { %p1296_p11 = pneg %p1687_p10  ;;  %s1577_s16 = smov 64  }
  0x18   : > { %s1578_s17 = smov 4   ;;  %s1579_s22 = smov [#allocation2]  }
  0x19   : > { %p1698_p12 = pnand %p1313_p9, %p1296_p11  ;;  %s268_s23 = sshll.u32 %s1579_s22, 4  ;;  %s269_s23 = int_to_ptr.vmem [resolvable:$true] %s268_s23 }
  0x1a   : > { %s1580_s25 = smov 128   ;;  %s294_s28 = sshll.u32 %s1914_s4, 4  ;;  %s295_s28 = int_to_ptr.hbm [resolvable:$true] %s294_s28 }
  0x1b   : > { %s280_s24 = sshll.u32 %s1933_s3, 4  ;;  %s1581_s3 = smov 8   ;;  %s281_s24 = int_to_ptr.hbm [resolvable:$true] %s280_s24 }
  0x1c   : > { %s266_s14 = sshll.u32 %s1935_s0, 4  ;;  %s1582_s29 = smov [#allocation7]   ;;  %s267_s14 = int_to_ptr.hbm [resolvable:$true] %s266_s14 }
  0x1d   : > { %1302 = dma.hbm_to_vmem [thread:$0]  (!%p1698_p12), %s281_s24, 192, %s283_s26, [#allocation6], %s1577_s16, %s1577_s16, %s1578_s17  }
  0x1e   : > { %1299 = dma.hbm_to_vmem [thread:$0]  (!%p1698_p12), %s267_s14, 256, %s269_s23, [#allocation3], %s1580_s25, %s1580_s25, %s1581_s3  }
  0x1f   : > { %s296_s0 = sshll.u32 %s1582_s29, 4  ;;  %s311_s24 = sshll.u32 %s1916_s6, 4  ;;  %s297_s0 = int_to_ptr.vmem [resolvable:$true] %s296_s0  ;;  %s312_s24 = int_to_ptr.hbm [resolvable:$true] %s311_s24 }
  0x20   : > { %1305 = dma.hbm_to_vmem [thread:$0]  (!%p1698_p12), %s295_s28, 1536, %s297_s0, [#allocation6], %s1580_s25, %s1580_s25, %s1581_s3  }
  0x21   : > { %s1583_s26 = smov [#allocation8]   ;;  %351 = sbr.rel (%p1687_p10) target bundleno = 1149 (0x47d), region = 56 }
  0x22   : > { %s313_s16 = sshll.u32 %s1583_s26, 4  ;;  %s314_s16 = int_to_ptr.vmem [resolvable:$true] %s313_s16 }
  0x23   : > { %1308 = dma.hbm_to_vmem [thread:$0]  (!%p1698_p12), %s312_s24, 1536, %s314_s16, [#allocation9], %s1580_s25, %s1580_s25, %s1581_s3  }
  0x26   : > { %1545 = dma.done.wait (%p1313_p9), [#allocation3], 256  }
  0x27   : > { %1547 = vsyncadd (%p1313_p9), [#allocation3], 4294967040 }
  0x28   : > { %1549 = dma.done.wait (%p1313_p9), [#allocation6], 1728  }
  0x29   : > { %1551 = vsyncadd (%p1313_p9), [#allocation6], 4294965568 }
  0x2a   : > { %1553 = dma.done.wait (%p1313_p9), [#allocation9], 1536  }
  0x2b   : > { %1555 = vsyncadd (%p1313_p9), [#allocation9], 4294965760  ;;  %p408_p13 = scmp.lt.s32.totalorder %s1659_s13, 1  ;;  %v1747_v2 = vld [vmem:[#allocation2] sm:$0xff]  ;;  %vm424_vm0 = vcmask 130048   ;;  %v1749_v3 = vld [vmem:[#allocation2 + $0x8] sm:$0xff] }
  0x2c   : > { %vm573_vm1 = vcmask 1043456   ;;  %v601_v6 = vld [vmem:[#allocation5 + $0x4] sm:$0xf]  ;;  %v534_v8 = vld [vmem:[#allocation7 + $0x10] sm:$0xff]  ;;  %v533_v9 = vld [vmem:[#allocation7 + $0x8] sm:$0xff]  ;;  %vm536_vm2 = vcmask 261120  }
  0x2d   : > { %s409_s0 = scalar_select %p408_p13, %s1659_s13, 1  ;;  %v535_v7 = vld [vmem:[#allocation7 + $0x18] sm:$0xff]  ;;  %v532_v10 = vld [vmem:[#allocation7] sm:$0xff]  ;;  %vm566_vm3 = vcmask 31744   ;;  %v531_v13 = vld [vmem:[#allocation5] sm:$0xf] }
  0x2e   : > { %v640_v16 = vld [vmem:[#allocation7 + $0x38] sm:$0xff]  ;;  %v639_v17 = vld [vmem:[#allocation7 + $0x30] sm:$0xff]  ;;  %v638_v18 = vld [vmem:[#allocation7 + $0x28] sm:$0xff]  ;;  %s1584_s14 = smov 32   ;;  %s405_s11 = sand.u32 1, %s1566_s10  }
  0x2f   : > { %s1271_s3 = sshll.u32 %s409_s0, 4  ;;  %v637_v19 = vld [vmem:[#allocation7 + $0x20] sm:$0xff]  ;;  %v673_v20 = vld [vmem:[#allocation5 + $0x8] sm:$0xf]  ;;  %v711_v22 = vld [vmem:[#allocation7 + $0x50] sm:$0xff]  ;;  %s1215_s15 = sshll.u32 %s405_s11, 4 }
  0x30   : > { %s412_s18 = scalar_lea.vmem %s1911_s1, %s1271_s3  ;;  %s417_s27 = scalar_lea.vmem %s1912_s2, %s1271_s3  ;;  %v712_v21 = vld [vmem:[#allocation7 + $0x58] sm:$0xff]  ;;  %v710_v23 = vld [vmem:[#allocation7 + $0x48] sm:$0xff]  ;;  %v709_v24 = vld [vmem:[#allocation7 + $0x40] sm:$0xff] }
  0x31   : > { %v1741_v0 = vld [vmem:[%s412_s18 + $0x8] sm:$0xff]  ;;  %v1743_v1 = vld [vmem:[%s412_s18] sm:$0xff]  ;;  %v844_v44 = vld [vmem:[#allocation8 + $0x18] sm:$0xff]  ;;  %s1585_s3 = smov 96   ;;  %s1273_s18 = sshll.u32 %s1659_s13, 4 }
  0x32   : > { %445 = vmatpush.msra.mxu0 %v1741_v0  ;;  %1274 = vmatpush.msra.mxu2 %v1741_v0  ;;  %v1751_v4 = vld [vmem:[%s417_s27 + $0x8] sm:$0xff]  ;;  %v1759_v5 = vld [vmem:[%s417_s27] sm:$0xff]  ;;  %s1084_s27 = scalar_lea.hbm %s1919_s9, %s1273_s18  ;;  %s1073_s23 = scalar_lea.sflag [#allocation4], %s405_s11 }
  0x33   : > { %1040 = vrot.lane.b32.xlu0 %v1759_v5, %s1584_s14  ;;  %v843_v45 = vld [vmem:[#allocation8 + $0x10] sm:$0xff]  ;;  %v1366_v51 = vld [vmem:[%s1917_s7] ss:$0 sm:$0xff]  ;;  %v842_v52 = vld [vmem:[#allocation8 + $0x8] sm:$0xff]  ;;  %s1087_s22 = sshll.u32 %s1084_s27, 4  ;;  %s1520_s24 = scalar_lea.hbm %s1919_s9, 32  ;;  %s1088_s22 = int_to_ptr.hbm [resolvable:$true] %s1087_s22 }
  0x34   : > { %446 = vmatpush.msra.mxu0 %v1743_v1  ;;  %1275 = vmatpush.msra.mxu2 %v1743_v1  ;;  %v841_v55 = vld [vmem:[#allocation8] sm:$0xff]  ;;  %s1514_s25 = sshra.s32 %s1088_s22, 4  ;;  %s1515_s25 = int_to_ptr.hbm [resolvable:$true] %s1514_s25 }
  0x35   : > { %1220 = vmatmul.msk.f32.vlgmr.msra.gmra.mxu0 %vm424_vm0, %v1747_v2  ;;  %1221 = vmatmul.msk.f32.vlgmr.msra.gmra.mxu2 %vm424_vm0, %v1749_v3  ;;  %v840_v56 = vld [vmem:[%s1915_s5] sm:$0xf]  ;;  %s1516_s13 = scalar_lea.hbm %s1515_s25, 16  ;;  %p1521_p3 = scmp.lt.s32.totalorder %s1515_s25, %s1919_s9 }
  0x36   : > { %495 = vmatpush.msrb.mxu2 %v1751_v4  ;;  %555 = vmatpush.msrb.mxu0 %v535_v7  ;;  %p1517_p0 = scmp.ne.s32.totalorder %s1515_s25, %s1516_s13  ;;  %p1522_p4 = scmp.lt.s32.totalorder %s1520_s24, %s1516_s13 }
  0x38   : > { %496 = vmatpush.msrb.mxu2 %v1759_v5  ;;  %556 = vmatpush.msrb.mxu0 %v534_v8  ;;  %p1518_p1 = pnand %p1517_p0, %p1676_p5  ;;  %p1523_p7 = por %p1522_p4, %p1521_p3 }
  0x3a   : > { %1233 = vmatpush.msk.msra.mxu2 %vm573_vm1, %v601_v6  ;;  %557 = vmatpush.msrb.mxu0 %v533_v9  ;;  %p1519_p2 = pneg %p1518_p1 }
  0x3b   : > { %1042 = vrot.lane.b32.xlu0 %v1751_v4, %s1584_s14 }
  0x3c   : > { %558 = vmatpush.msrb.mxu0 %v532_v10  ;;  %p1524_p8 = pnand %p1523_p7, %p1519_p2 }
  0x3d   : > { %1224 = vmatmul.msk.f32.vlgmr.msrb.gmra.mxu2 %vm424_vm0, %v1747_v2  ;;  %1228 = vmatmul.msk.f32.vlgmr.msrb.gmra.mxu0 %vm536_vm2, %v1759_v5 }
  0x3e   : > { %1238 = vmatpush.msk.msra.mxu0 %vm573_vm1, %v673_v20 }
  0x40   : > { %863 = vmatpush.msrb.mxu0 %v844_v44  ;;  %v997_v44 = vld [vmem:[#allocation8 + $0x40] sm:$0xff] }
  0x42   : > { %864 = vmatpush.msrb.mxu0 %v843_v45 }
  0x44   : > { %865 = vmatpush.msrb.mxu0 %v842_v52 }
  0x45   : > { %1225 = vmatmul.msk.f32.gmra.mxu2 %vm424_vm0, %v1749_v3  ;;  %1229 = vmatmul.msk.f32.gmra.mxu0 %vm536_vm2, %v1751_v4 }
  0x46   : > { %866 = vmatpush.msrb.mxu0 %v841_v55 }
  0xb2   : > { %v1772_v11 = vpop.f32.mrf.mxu0 }
  0xb3   : > { %1234 = vmatmul.msk.f32.vlgmr.msra.gmra.mxu2 %vm566_vm3, %v1772_v11 }
  0xb8   : > { %v1776_v12 = vpop.f32.mrf.mxu2 }
  0xb9   : > { %468 = vmatpush.msra.mxu1 %v1776_v12  ;;  %1276 = vmatpush.msra.mxu3 %v1776_v12 }
  0xba   : > { %v560_v37 = vpop.f32.mrf.mxu0 }
  0xbb   : > { %469 = vmatpush.msra.mxu1 %v1772_v11  ;;  %1235 = vmatmul.msk.f32.gmra.mxu2 %vm566_vm3, %v1776_v12 }
  0xbc   : > { %1222 = vmatmul.msk.f32.vlgmr.msra.gmra.mxu1 %vm424_vm0, %v1747_v2  ;;  %1277 = vmatpush.msra.mxu3 %v1772_v11 }
  0xbd   : > { %1223 = vmatmul.msk.f32.vlgmr.msra.gmra.mxu3 %vm424_vm0, %v1749_v3  ;;  %1230 = vmatpush.msk.msrb.mxu1 %vm573_vm1, %v531_v13 }
  0xbf   : > { %731 = vmatpush.msra.mxu1 %v712_v21 }
  0xc0   : > { %v498_v14 = vpop.f32.mrf.mxu2 }
  0xc1   : > { %732 = vmatpush.msra.mxu1 %v711_v22 }
  0xc2   : > { %v563_v39 = vpop.f32.mrf.mxu0 }
  0xc3   : > { %733 = vmatpush.msra.mxu1 %v710_v23 }
  0xc4   : > { %1231 = vmatmul.msk.f32.vlgmr.msrb.gmra.mxu1 %vm566_vm3, %v1743_v1 }
  0xc5   : > { %734 = vmatpush.msra.mxu1 %v709_v24 }
  0xc7   : > { %1251 = vmatpush.msk.msrb.mxu1 %vm573_vm1, %v840_v56 }
  0xc8   : > { %v501_v15 = vpop.f32.mrf.mxu2 }
  0xc9   : > { %518 = vmatpush.msrb.mxu3 %v501_v15 }
  0xcb   : > { %519 = vmatpush.msrb.mxu3 %v498_v14 }
  0xcc   : > { %1226 = vmatmul.msk.f32.vlgmr.msrb.gmra.mxu3 %vm424_vm0, %v1747_v2  ;;  %1232 = vmatmul.msk.f32.gmra.mxu1 %vm566_vm3, %v1741_v0 }
  0xcd   : > { %659 = vmatpush.msra.mxu3 %v640_v16 }
  0xcf   : > { %660 = vmatpush.msra.mxu3 %v639_v17 }
  0xd1   : > { %661 = vmatpush.msra.mxu3 %v638_v18 }
  0xd3   : > { %662 = vmatpush.msra.mxu3 %v637_v19 }
  0xd4   : > { %1227 = vmatmul.msk.f32.gmra.mxu3 %vm424_vm0, %v1749_v3 }
  0xdc   : > { %1236 = vmatmul.msk.f32.vlgmr.msra.gmra.mxu3 %vm536_vm2, %v498_v14 }
  0xe4   : > { %1237 = vmatmul.msk.f32.gmra.mxu3 %vm536_vm2, %v501_v15  ;;  %v1260_v15 = vld [vmem:[%s1915_s5 + $0x8] sm:$0xf] }
 0x136   : > { %v628_v40 = vpop.f32.mrf.mxu2 }
 0x139   : > { %v471_v25 = vpop.f32.mrf.mxu1 }
 0x13a   : > { %v477_v26 = vmul.f32 2.0, %v471_v25 }
 0x13c   : > { %v1805_v27 = vsub.f32 %v477_v26, %v1743_v1 }
 0x13e   : > { %1239 = vmatmul.msk.f32.vlgmr.msra.gmra.mxu0 %vm566_vm3, %v1805_v27  ;;  %v631_v57 = vpop.f32.mrf.mxu2 }
 0x13f   : > { %1261 = vmatpush.msk.msra.mxu0 %vm573_vm1, %v1260_v15 }
 0x140   : > { %v474_v28 = vpop.f32.mrf.mxu3 }
 0x141   : > { %v478_v29 = vmul.f32 2.0, %v474_v28  ;;  %v594_v38 = vpop.f32.mrf.mxu1 }
 0x142   : > { %v595_v41 = vadd.f32 %v594_v38, %v560_v37 }
 0x143   : > { %v1810_v30 = vsub.f32 %v478_v29, %v1741_v0 }
 0x144   : > { %v634_v47 = vadd.f32 %v628_v40, %v595_v41  ;;  %v1000_v40 = vld [vmem:[#allocation8 + $0x58] sm:$0xff] }
 0x146   : > { %1240 = vmatmul.msk.f32.gmra.mxu0 %vm566_vm3, %v1810_v30 }
 0x149   : > { %v597_v42 = vpop.f32.mrf.mxu1 }
 0x14a   : > { %v598_v49 = vadd.f32 %v597_v42, %v563_v39  ;;  %v934_v42 = vld [vmem:[#allocation8 + $0x38] sm:$0xff] }
 0x14c   : > { %v635_v59 = vadd.f32 %v631_v57, %v598_v49 }
 0x14f   : > { %v521_v31 = vpop.f32.mrf.mxu3 }
 0x150   : > { %v527_v32 = vmul.f32 2.0, %v521_v31 }
 0x152   : > { %v529_v33 = vsub.f32 %v527_v32, %v1759_v5 }
 0x154   : > { %1241 = vmatmul.msk.f32.vlgmr.msra.gmra.mxu1 %vm536_vm2, %v529_v33 }
 0x155   : > { %1019 = vmatpush.msra.mxu1 %v1000_v40 }
 0x157   : > { %v524_v34 = vpop.f32.mrf.mxu3 }
 0x158   : > { %v528_v35 = vmul.f32 2.0, %v524_v34 }
 0x15a   : > { %v530_v36 = vsub.f32 %v528_v35, %v1751_v4 }
 0x15c   : > { %1242 = vmatmul.msk.f32.gmra.mxu1 %vm536_vm2, %v530_v36 }
 0x15f   : > { %v664_v43 = vpop.f32.mrf.mxu3 }
 0x160   : > { %v670_v48 = vadd.f32 %v664_v43, %v634_v47  ;;  %v932_v43 = vld [vmem:[#allocation8 + $0x28] sm:$0xff] }
 0x164   : > { %1252 = vmatmul.msk.f32.vlgmr.msrb.gmra.mxu1 %vm566_vm3, %v1743_v1 }
 0x167   : > { %v667_v58 = vpop.f32.mrf.mxu3 }
 0x168   : > { %v671_v62 = vadd.f32 %v667_v58, %v635_v59 }
 0x16c   : > { %1253 = vmatmul.msk.f32.gmra.mxu1 %vm566_vm3, %v1741_v0 }
 0x1bb   : > { %v700_v46 = vpop.f32.mrf.mxu0 }
 0x1bc   : > { %v706_v50 = vadd.f32 %v700_v46, %v670_v48 }
 0x1c3   : > { %v703_v61 = vpop.f32.mrf.mxu0 }
 0x1c4   : > { %v707_v6 = vadd.f32 %v703_v61, %v671_v62  ;;  %v1367_v62 = vld [vmem:[%s1918_s8] ss:$0 sm:$0xff] }
 0x1d1   : > { %v736_v53 = vpop.f32.mrf.mxu1 }
 0x1d2   : > { %v742_v54 = vadd.f32 %v736_v53, %v706_v50 }
 0x1d4   : > { %v748_v60 = vadd.f32 %v1366_v51, %v742_v54 }
 0x1d6   : > { %v1243_v63 = vmul.f32 -1.442695, %v748_v60 }
 0x1d8   : > { %1368 = vpow2.f32 %v1243_v63 }
 0x1d9   : > { %v739_v7 = vpop.f32.mrf.mxu1 }
 0x1da   : > { %v743_v8 = vadd.f32 %v739_v7, %v707_v6 }
 0x1dc   : > { %v749_v9 = vadd.f32 %v1366_v51, %v743_v8 }
 0x1de   : > { %v1369_v10 = vpop.eup %1368  ;;  %v1244_v13 = vmul.f32 -1.442695, %v749_v9 }
 0x1df   : > { %v756_v14 = vadd.f32 1.0, %v1369_v10 }
 0x1e0   : > { %1370 = vpow2.f32 %v1244_v13 }
 0x1e1   : > { %1372 = vrcp.f32 %v756_v14  ;;  %v769_v20 = vand.u32 2147483648, %v756_v14  ;;  %v767_v0 = vand.u32 2147483647, %v756_v14  ;;  %vm763_vm5 = vweird.f32 %v756_v14  ;;  %v894_v50 = vpop.f32.mrf.mxu1 }
 0x1e3   : > { %v770_v24 = vor.u32 1.1754944e-38, %v769_v20  ;;  %vm768_vm7 = vcmp.eq.f32.partialorder %v767_v0, 8.507059e+37 }
 0x1e6   : > { %v1371_v1 = vpop.eup %1370 }
 0x1e7   : > { %v1373_v16 = vpop.eup %1372  ;;  %v757_v17 = vadd.f32 1.0, %v1371_v1 }
 0x1e8   : > { %v759_v18 = vmul.f32 %v1373_v16, %v756_v14  ;;  %vm764_vm4 = vweird.f32 %v1373_v16 }
 0x1e9   : > { %1374 = vrcp.f32 %v757_v17  ;;  %vm765_vm6 = vmor %vm763_vm5, %vm764_vm4  ;;  %v784_v32 = vand.u32 2147483648, %v757_v17  ;;  %v782_v34 = vand.u32 2147483647, %v757_v17  ;;  %vm778_vm9 = vweird.f32 %v757_v17  ;;  %v897_v55 = vpop.f32.mrf.mxu1 }
 0x1ea   : > { %v760_v19 = vsub.f32 1.0, %v759_v18 }
 0x1eb   : > { %v785_v36 = vor.u32 1.1754944e-38, %v784_v32  ;;  %vm783_vm11 = vcmp.eq.f32.partialorder %v782_v34, 8.507059e+37 }
 0x1ec   : > { %v761_v21 = vmul.f32 %v1373_v16, %v760_v19  ;;  %v1041_v19 = vpop.permute.xlu0 %1040 }
 0x1ee   : > { %v762_v22 = vadd.f32 %v1373_v16, %v761_v21 }
 0x1ef   : > { %v1375_v23 = vpop.eup %1374 }
 0x1f0   : > { %v766_v25 = vsel %vm765_vm6, %v1373_v16, %v762_v22  ;;  %v774_v26 = vmul.f32 %v1375_v23, %v757_v17  ;;  %vm779_vm8 = vweird.f32 %v1375_v23 }
 0x1f1   : > { %v1833_v28 = vsel %vm768_vm7, %v770_v24, %v766_v25  ;;  %vm780_vm10 = vmor %vm778_vm9, %vm779_vm8 }
 0x1f2   : > { %v788_v29 = vmul.f32 %v1833_v28, %v1759_v5  ;;  %v775_v31 = vsub.f32 1.0, %v774_v26  ;;  %v1254_v5 = vld [vmem:[%s1915_s5 + $0x4] sm:$0xf]  ;;  %v1048_v20 = vsub.f32 1.0, %v1833_v28  ;;  %v1046_v0 = vmul.f32 %v1041_v19, %v1833_v28 }
 0x1f4   : > { %1249 = vmatmul.msk.f32.vlgmr.msrb.gmra.mxu0 %vm536_vm2, %v788_v29  ;;  %v776_v33 = vmul.f32 %v1375_v23, %v775_v31  ;;  %v1043_v24 = vpop.permute.xlu0 %1042 }
 0x1f6   : > { %v777_v35 = vadd.f32 %v1375_v23, %v776_v33 }
 0x1f8   : > { %v781_v37 = vsel %vm780_vm10, %v1375_v23, %v777_v35 }
 0x1f9   : > { %v1838_v38 = vsel %vm783_vm11, %v785_v36, %v781_v37 }
 0x1fa   : > { %v789_v39 = vmul.f32 %v1838_v38, %v1751_v4  ;;  %v1049_v25 = vsub.f32 1.0, %v1838_v38 }
 0x1fc   : > { %804 = vmatpush.msrb.mxu2 %v789_v39  ;;  %1250 = vmatmul.msk.f32.gmra.mxu0 %vm536_vm2, %v789_v39 }
 0x1fe   : > { %805 = vmatpush.msrb.mxu2 %v788_v29 }
 0x1ff   : > { %1245 = vmatmul.msk.f32.vlgmr.msrb.gmra.mxu2 %vm424_vm0, %v1747_v2 }
 0x200   : > { %1255 = vmatpush.msk.msra.mxu2 %vm573_vm1, %v1254_v5 }
 0x204   : > { %1262 = vmatmul.msk.f32.vlgmr.msra.gmra.mxu0 %vm566_vm3, %v1805_v27  ;;  %v933_v27 = vld [vmem:[#allocation8 + $0x30] sm:$0xff] }
 0x207   : > { %1246 = vmatmul.msk.f32.gmra.mxu2 %vm424_vm0, %v1749_v3 }
 0x20c   : > { %1263 = vmatmul.msk.f32.gmra.mxu0 %vm566_vm3, %v1810_v30  ;;  %v931_v30 = vld [vmem:[#allocation8 + $0x20] sm:$0xff] }
 0x20f   : > { %1256 = vmatmul.msk.f32.vlgmr.msra.gmra.mxu2 %vm566_vm3, %v1772_v11  ;;  %v999_v11 = vld [vmem:[#allocation8 + $0x50] sm:$0xff] }
 0x210   : > { %1020 = vmatpush.msra.mxu1 %v999_v11 }
 0x217   : > { %1257 = vmatmul.msk.f32.gmra.mxu2 %vm566_vm3, %v1776_v12  ;;  %v998_v12 = vld [vmem:[#allocation8 + $0x48] sm:$0xff] }
 0x218   : > { %1021 = vmatpush.msra.mxu1 %v998_v12 }
 0x21a   : > { %1022 = vmatpush.msra.mxu1 %v997_v44 }
 0x282   : > { %v807_v4 = vpop.f32.mrf.mxu2 }
 0x28a   : > { %v810_v41 = vpop.f32.mrf.mxu2 }
 0x28b   : > { %827 = vmatpush.msrb.mxu3 %v810_v41 }
 0x28d   : > { %828 = vmatpush.msrb.mxu3 %v807_v4 }
 0x28e   : > { %1247 = vmatmul.msk.f32.vlgmr.msrb.gmra.mxu3 %vm424_vm0, %v1747_v2 }
 0x28f   : > { %953 = vmatpush.msra.mxu3 %v934_v42 }
 0x291   : > { %954 = vmatpush.msra.mxu3 %v933_v27 }
 0x292   : > { %v922_v52 = vpop.f32.mrf.mxu2 }
 0x293   : > { %955 = vmatpush.msra.mxu3 %v932_v43 }
 0x295   : > { %956 = vmatpush.msra.mxu3 %v931_v30 }
 0x296   : > { %1248 = vmatmul.msk.f32.gmra.mxu3 %vm424_vm0, %v1749_v3  ;;  %v868_v3 = vpop.f32.mrf.mxu0 }
 0x297   : > { %v895_v54 = vadd.f32 %v894_v50, %v868_v3 }
 0x299   : > { %v928_v56 = vadd.f32 %v922_v52, %v895_v54 }
 0x29a   : > { %v925_v59 = vpop.f32.mrf.mxu2 }
 0x29e   : > { %1258 = vmatmul.msk.f32.vlgmr.msra.gmra.mxu3 %vm536_vm2, %v807_v4  ;;  %v871_v51 = vpop.f32.mrf.mxu0 }
 0x29f   : > { %v898_v60 = vadd.f32 %v897_v55, %v871_v51 }
 0x2a1   : > { %v929_v7 = vadd.f32 %v925_v59, %v898_v60 }
 0x2a6   : > { %1259 = vmatmul.msk.f32.gmra.mxu3 %vm536_vm2, %v810_v41  ;;  %v988_v58 = vpop.f32.mrf.mxu0 }
 0x2ae   : > { %v991_v13 = vpop.f32.mrf.mxu0 }
 0x311   : > { %v830_v2 = vpop.f32.mrf.mxu3 }
 0x312   : > { %v836_v45 = vmul.f32 2.0, %v830_v2 }
 0x314   : > { %v838_v46 = vsub.f32 %v836_v45, %v788_v29  ;;  %v1047_v29 = vmul.f32 %v1043_v24, %v1838_v38 }
 0x316   : > { %1264 = vmatmul.msk.f32.vlgmr.msra.gmra.mxu1 %vm536_vm2, %v838_v46 }
 0x319   : > { %v833_v47 = vpop.f32.mrf.mxu3 }
 0x31a   : > { %v837_v48 = vmul.f32 2.0, %v833_v47 }
 0x31c   : > { %v839_v49 = vsub.f32 %v837_v48, %v789_v39 }
 0x31e   : > { %1265 = vmatmul.msk.f32.gmra.mxu1 %vm536_vm2, %v839_v49 }
 0x321   : > { %v958_v53 = vpop.f32.mrf.mxu3 }
 0x322   : > { %v964_v57 = vadd.f32 %v958_v53, %v928_v56 }
 0x324   : > { %v994_v61 = vadd.f32 %v988_v58, %v964_v57 }
 0x329   : > { %v961_v63 = vpop.f32.mrf.mxu3 }
 0x32a   : > { %v965_v9 = vadd.f32 %v961_v63, %v929_v7 }
 0x32c   : > { %v995_v14 = vadd.f32 %v991_v13, %v965_v9 }
 0x393   : > { %v1024_v6 = vpop.f32.mrf.mxu1 }
 0x394   : > { %v1030_v8 = vadd.f32 %v1024_v6, %v994_v61 }
 0x396   : > { %v1036_v10 = vadd.f32 %v1367_v62, %v1030_v8 }
 0x398   : > { %1376 = vtanh.f32 %v1036_v10 }
 0x39b   : > { %v1027_v15 = vpop.f32.mrf.mxu1 }
 0x39c   : > { %v1031_v1 = vadd.f32 %v1027_v15, %v995_v14 }
 0x39e   : > { %v1377_v16 = vpop.eup %1376  ;;  %v1037_v17 = vadd.f32 %v1367_v62, %v1031_v1 }
 0x39f   : > { %1052 = vrot.lane.b32.xlu1 %v1377_v16, %s1584_s14 }
 0x3a0   : > { %1378 = vtanh.f32 %v1037_v17 }
 0x3a6   : > { %v1379_v18 = vpop.eup %1378 }
 0x3a7   : > { %1054 = vrot.lane.b32.xlu1 %v1379_v18, %s1584_s14  ;;  %s407_s14 = scalar_lea.vmem [#allocation10], %s1215_s15 }
 0x3a8   : > { %s1085_s17 = sshll.u32 %s407_s14, 4  ;;  %s1086_s17 = int_to_ptr.vmem [resolvable:$true] %s1085_s17 }
 0x411   : > { %v1053_v21 = vpop.permute.xlu1 %1052 }
 0x412   : > { %v1058_v22 = vmul.f32 %v1053_v21, %v1048_v20 }
 0x414   : > { %v1060_v23 = vadd.f32 %v1058_v22, %v1046_v0 }
 0x416   : > { %1064 = vrot.lane.b32.xlu2 %v1060_v23, %s1585_s3 }
 0x419   : > { %v1055_v26 = vpop.permute.xlu1 %1054 }
 0x41a   : > { %v1059_v31 = vmul.f32 %v1055_v26, %v1049_v25 }
 0x41c   : > { %v1061_v32 = vadd.f32 %v1059_v31, %v1047_v29 }
 0x41e   : > { %1066 = vrot.lane.b32.xlu2 %v1061_v32, %s1585_s3 }
 0x470   : > { %v1065_v33 = vpop.permute.xlu2 %1064 }
 0x471   : > { %1070 = vst.msk [vmem:[%s407_s14] sm:$0xff] %vm536_vm2, %v1065_v33 }
 0x478   : > { %v1067_v28 = vpop.permute.xlu2 %1066 }
 0x479   : > { %1071 = vst.msk [vmem:[%s407_s14 + $0x8] sm:$0xff] %vm536_vm2, %v1067_v28 }
 0x47a   : > { %1527 = shalt.err (!%p1524_p8)
}
 0x47b   : > { %s1586_s0 = smov 128   ;;  %s1587_s3 = smov 8  }
 0x47c   : > { %1294 = dma.vmem_to_hbm [thread:$0]  (%p1676_p5), %s1086_s17, 256, %s1088_s22, %s1073_s23, %s1586_s0, %s1586_s0, %s1587_s3  }
 0x47d PF: > { %p1321_p9 = scmp.ge.s32.totalorder %s1574_s12, 2  ;;  %s1102_s15 = sand.u32 1, %s1562_s30  }
 0x47e   : > { %s1103_s18 = scalar_lea.sflag [#allocation4], %s1102_s15 }
 0x47f   : > { %p1310_p10 = pnand %p1321_p9, %p1680_p6 }
 0x481   : > { %p1311_p11 = pneg %p1310_p10 }
 0x483   : > { %1557 = dma.done.wait (%p1311_p11), %s1103_s18, 256  }
 0x484   : > { %1559 = vsyncadd (%p1311_p11), %s1103_s18, 4294967040  ;;  %s1937_s12 = sld [smem:[#allocation16_spill]]  ;;  %s1940_s30 = smov %s1566_s10 }
 0x485   : > { %s1938_s20 = sld [smem:[#allocation15_spill]] }
 0x486   : > { %s1939_s11 = sld [smem:[#allocation17_spill]] }
 0x48a   : > { %p22_p12 = scmp.ge.s32.totalorder %s1937_s12, 4  }
 0x48b   : > { %s1941_s10 = smov %s1938_s20 }
 0x48c   :  { %24 = sbr.rel (!%p22_p12) target bundleno = 9 (0x9), region = 119 }
 0x491   :  { %1109 = vsyncpa [#allocation3], 1 }
 0x492   :  { %1111 = vsyncpa [#allocation3 + $0x1], 1 }
 0x493   :  { %1112 = vsyncpa [#allocation6], 1 }
 0x494   :  { %1113 = vsyncpa [#allocation9], 1 }
 0x495   :  { %1114 = vsyncpa [#allocation4], 1 }
 0x496   :  { %1116 = vsyncpa [#allocation4 + $0x1], 1 }

</bundles_post_ra>
